<compile_context>
chip_gen: v6e
topology: v6e:2x2x1
jax: 0.10.0
libtpu: 0.0.40
codegen_flags: <defaults>
</compile_context>

<pallas_src>
import functools

import jax
import jax.numpy as jnp
from jax.experimental import pallas as pl
from jax.experimental.pallas import tpu as pltpu

IN_DIM = 768
OUT_DIM = 512


def _round_up(n, m):
    return ((n + m - 1) // m) * m


def _feature_embedder_kernel(x_ref, w_ref, b_ref, o_ref):
    # Cast activations to bf16 in-kernel (VPU work, hidden under DMA/MXU); f32 accumulate.
    x_bf = x_ref[...].astype(jnp.bfloat16)
    feat = jnp.dot(x_bf, w_ref[...], preferred_element_type=jnp.float32)
    # Bias + ReLU in f32.
    feat = jnp.maximum(feat + b_ref[...], 0.0)
    # TODO(synk): nn.Dropout(0.5) is identity in eval mode; training-mode dropout not implemented.
    # norm_flag=True path:
    #   denom = clamp(||feat||_2 (dim=1), 1e-12) ** 0.5 * sqrt(2)
    #   1/denom == rsqrt(2 * clamp(||feat||_2, 1e-12))  -> single EUP rsqrt per row
    l2 = jnp.sqrt(jnp.sum(feat * feat, axis=1, keepdims=True))
    inv = jax.lax.rsqrt(2.0 * jnp.maximum(l2, jnp.float32(1e-12)))
    o_ref[...] = (feat * inv).astype(o_ref.dtype)


def init_feature_embedder_params(key):
    """Deterministic init matching the torch module: weight ~ N(0, 0.005), bias = 0.1.

    Returns (w_bf16_transposed, b_f32) pre-cast ONCE so the forward path does no per-call
    weight conversion.
    """
    w = jax.random.normal(key, (OUT_DIM, IN_DIM), dtype=jnp.float32) * 0.005  # torch (out, in)
    w_bf = w.T.astype(jnp.bfloat16)                                           # (in, out) for x @ W^T
    b_f32 = jnp.full((1, OUT_DIM), 0.1, dtype=jnp.float32)
    return w_bf, b_f32


@functools.partial(jax.jit, static_argnames=("block_b", "out_dtype"))
def feature_embedder_forward(x, w_bf, b_f32, *, block_b=1024, out_dtype=jnp.float32):
    """x: (B, 768) f32, w_bf: (768, 512) bf16, b_f32: (1, 512) f32. Returns (B, 512)."""
    B, in_dim = x.shape
    out_dim = w_bf.shape[1]

    # Batch tile: multiple of 16, capped by block_b; no host-side padding (partial last
    # block handled by Pallas, epilogue is row-wise so that's safe).
    tb = min(block_b, _round_up(B, 16))
    # Keep >=2 grid steps when B is large enough so the "parallel" axis actually shards
    # across both v7x TensorCores (no-op cost on single-TC v5e/v6e).
    if B >= 32:
        tb = min(tb, _round_up(pl.cdiv(B, 2), 16))
    grid = (pl.cdiv(B, tb),)

    # VMEM budget derived from actual tiles (+ headroom), floored at the scoped default.
    vmem_bytes = (
        2 * tb * in_dim * 4            # double-buffered f32 activation tiles
        + 2 * in_dim * out_dim * 2     # resident bf16 weight (allocated double-buffered)
        + 2 * tb * out_dim * jnp.dtype(out_dtype).itemsize  # double-buffered output tiles
        + 2 * out_dim * 4              # bias
        + (8 << 20)                    # compiler scratch headroom
    )
    vmem_bytes = int(min(max(vmem_bytes, 32 << 20), 128 << 20))

    cost = pl.CostEstimate(
        flops=2 * B * in_dim * out_dim,
        transcendentals=2 * B,  # sqrt + rsqrt per row
        bytes_accessed=(
            B * in_dim * 4
            + in_dim * out_dim * 2
            + out_dim * 4
            + B * out_dim * jnp.dtype(out_dtype).itemsize
        ),
    )

    out = pl.pallas_call(
        _feature_embedder_kernel,
        out_shape=jax.ShapeDtypeStruct((B, out_dim), out_dtype),
        grid_spec=pltpu.PrefetchScalarGridSpec(
            num_scalar_prefetch=0,
            grid=grid,
            in_specs=[
                pl.BlockSpec((tb, in_dim), lambda i: (i, 0)),       # activation tiles stream
                pl.BlockSpec((in_dim, out_dim), lambda i: (0, 0)),  # weight stays VMEM-resident
                pl.BlockSpec((1, out_dim), lambda i: (0, 0)),       # bias resident
            ],
            out_specs=pl.BlockSpec((tb, out_dim), lambda i: (i, 0)),
        ),
        compiler_params=pltpu.CompilerParams(
            dimension_semantics=("parallel",),  # rows independent -> v7x megacore sharding
            vmem_limit_bytes=vmem_bytes,
        ),
        cost_estimate=cost,
    )(x, w_bf, b_f32)

    return out


def _reference_checks(x, w_bf, b_f32, out):
    """Row-wise torch-equivalent references."""
    # Reference 1: same bf16-rounded operands, f32 math -> verifies the kernel itself (tight tol).
    x_bf = x.astype(jnp.bfloat16).astype(jnp.float32)
    w_f = w_bf.astype(jnp.float32)
    feat_bf = jnp.maximum(x_bf @ w_f + b_f32, 0.0)
    denom_bf = jnp.sqrt(jnp.clip(jnp.linalg.norm(feat_bf, axis=1, keepdims=True), 1e-12)) * jnp.sqrt(2.0)
    ref_bf = feat_bf / denom_bf
    assert jnp.allclose(out, ref_bf, atol=1e-4, rtol=1e-4), "kernel mismatch vs bf16-operand reference"

    # Reference 2: full f32 torch-equivalent math -> verifies semantics within bf16 matmul tolerance.
    feat_ref = jnp.maximum(x @ w_f + b_f32, 0.0)
    denom_ref = jnp.sqrt(jnp.clip(jnp.linalg.norm(feat_ref, axis=1, keepdims=True), 1e-12)) * jnp.sqrt(2.0)
    ref = feat_ref / denom_ref
    assert jnp.allclose(out, ref, atol=2e-2, rtol=2e-2), "kernel drifted from f32 reference"


if __name__ == "__main__":
    key = jax.random.PRNGKey(0)
    k_x, k_w, k_x2 = jax.random.split(key, 3)

    # Parameters pre-cast once (not per forward call).
    w_bf, b_f32 = init_feature_embedder_params(k_w)

    # Case 1: small batch (single grid step).
    B = 8
    x = jax.random.normal(k_x, (B, IN_DIM), dtype=jnp.float32)
    out = jax.block_until_ready(feature_embedder_forward(x, w_bf, b_f32))
    assert out.shape == (B, OUT_DIM) and out.dtype == jnp.float32
    _reference_checks(x, w_bf, b_f32, out)

    # Case 2: multi-step grid with a partial last block (no host-side pad/slice).
    B2 = 40
    x2 = jax.random.normal(k_x2, (B2, IN_DIM), dtype=jnp.float32)
    out2 = jax.block_until_ready(feature_embedder_forward(x2, w_bf, b_f32))
    assert out2.shape == (B2, OUT_DIM)
    _reference_checks(x2, w_bf, b_f32, out2)

    print("KERNEL_OK")
</pallas_src>

<mosaic_0001>
module attributes {stable_mosaic.version = 11 : i64} {
  func.func @_feature_embedder_kernel(%arg0: i32, %arg1: memref<16x768xf32, #tpu.memory_space<vmem>>, %arg2: memref<768x512xbf16, #tpu.memory_space<vmem>>, %arg3: memref<1x512xf32, #tpu.memory_space<vmem>>, %arg4: memref<16x512xf32, #tpu.memory_space<vmem>>) attributes {dimension_semantics = [#tpu.dimension_semantics<parallel>], iteration_bounds = array<i64: 1>, scalar_prefetch = 0 : i64, scratch_operands = 0 : i64, tpu.core_type = #tpu.core_type<tc>, window_params = [{transform_indices = @transform_0, window_bounds = array<i64: 16, 768>}, {pipeline_mode = #tpu.pipeline_mode<synchronous>, transform_indices = @transform_1, window_bounds = array<i64: 768, 512>}, {pipeline_mode = #tpu.pipeline_mode<synchronous>, transform_indices = @transform_2, window_bounds = array<i64: 1, 512>}, {transform_indices = @transform_3, window_bounds = array<i64: 16, 512>}]} {
    %c0 = arith.constant 0 : index
    %c0_0 = arith.constant 0 : index
    %0 = vector.load %arg1[%c0, %c0_0] : memref<16x768xf32, #tpu.memory_space<vmem>>, vector<16x768xf32>
    %1 = arith.truncf %0 : vector<16x768xf32> to vector<16x768xbf16>
    %c0_1 = arith.constant 0 : index
    %c0_2 = arith.constant 0 : index
    %2 = vector.load %arg2[%c0_1, %c0_2] : memref<768x512xbf16, #tpu.memory_space<vmem>>, vector<768x512xbf16>
    %cst = arith.constant dense<0.000000e+00> : vector<16x512xf32>
    %3 = tpu.matmul %1, %2, %cst {dimension_numbers = #tpu.dot_dimension_numbers<[1], [0], [0], [1], [0, 0, 1, 1], [], []>} : vector<16x768xbf16>, vector<768x512xbf16>, vector<16x512xf32> -> vector<16x512xf32>
    %c0_3 = arith.constant 0 : index
    %c0_4 = arith.constant 0 : index
    %4 = vector.load %arg3[%c0_3, %c0_4] : memref<1x512xf32, #tpu.memory_space<vmem>>, vector<1x512xf32>
    %5 = vector.broadcast %4 : vector<1x512xf32> to vector<16x512xf32>
    %6 = arith.addf %3, %5 : vector<16x512xf32>
    %cst_5 = arith.constant 0.000000e+00 : f32
    %7 = vector.broadcast %cst_5 : f32 to vector<16x512xf32>
    %8 = arith.maximumf %6, %7 : vector<16x512xf32>
    %9 = arith.mulf %8, %8 : vector<16x512xf32>
    %cst_6 = arith.constant dense<0.000000e+00> : vector<16xf32>
    %10 = vector.multi_reduction <add>, %9, %cst_6 [1] : vector<16x512xf32> to vector<16xf32>
    %11 = vector.shape_cast %10 : vector<16xf32> to vector<16x1xf32>
    %12 = math.sqrt %11 : vector<16x1xf32>
    %cst_7 = arith.constant 9.99999996E-13 : f32
    %13 = vector.broadcast %cst_7 : f32 to vector<16x1xf32>
    %14 = arith.maximumf %12, %13 : vector<16x1xf32>
    %cst_8 = arith.constant 2.000000e+00 : f32
    %15 = vector.broadcast %cst_8 : f32 to vector<16x1xf32>
    %16 = arith.mulf %15, %14 : vector<16x1xf32>
    %17 = math.rsqrt %16 : vector<16x1xf32>
    %18 = vector.broadcast %17 : vector<16x1xf32> to vector<16x512xf32>
    %19 = arith.mulf %8, %18 : vector<16x512xf32>
    %c0_9 = arith.constant 0 : index
    %c0_10 = arith.constant 0 : index
    %20 = vector.load %arg4[%c0_9, %c0_10] : memref<16x512xf32, #tpu.memory_space<vmem>>, vector<16x512xf32>
    tpu.vector_store %arg4[%c0_9, %c0_10], %19 {strides = array<i32>} : memref<16x512xf32, #tpu.memory_space<vmem>>, vector<16x512xf32>,
    return
  }
  func.func @transform_0(%arg0: i32) -> (i32, i32) {
    %c0_i32 = arith.constant 0 : i32
    %c0_i32_0 = arith.constant 0 : i32
    return %arg0, %c0_i32 : i32, i32
  }
  func.func @transform_1(%arg0: i32) -> (i32, i32) {
    %c0_i32 = arith.constant 0 : i32
    %c0_i32_0 = arith.constant 0 : i32
    %c0_i32_1 = arith.constant 0 : i32
    return %c0_i32, %c0_i32_0 : i32, i32
  }
  func.func @transform_2(%arg0: i32) -> (i32, i32) {
    %c0_i32 = arith.constant 0 : i32
    %c0_i32_0 = arith.constant 0 : i32
    %c0_i32_1 = arith.constant 0 : i32
    return %c0_i32, %c0_i32_0 : i32, i32
  }
  func.func @transform_3(%arg0: i32) -> (i32, i32) {
    %c0_i32 = arith.constant 0 : i32
    %c0_i32_0 = arith.constant 0 : i32
    return %arg0, %c0_i32 : i32, i32
  }
}

</mosaic_0001>

<bundles_post_ra>
// kernel: feature_embedder_forward.1
= control target key start
LH: loop header
LB: loop body
LE: loop exit
PB: predicated region body
PF: predicated region fallthrough
CT: control target
= control target key end

     0   :  { %8 = vsyncpa [#allocation3], 0  ;;  %s2250_s0 = inlined_call_operand.hbm [shape: f32[8,768], index: 0, kind: input, shape index: {}]   ;;  %s2251_s1 = inlined_call_operand.hbm [shape: bf16[768,512], index: 1, kind: input, shape index: {}]   ;;  %s2252_s2 = inlined_call_operand.hbm [shape: f32[1,512], index: 2, kind: input, shape index: {}]   ;;  %s2253_s3 = inlined_call_operand.hbm [shape: f32[8,512], index: 3, kind: output, shape index: {}]  }
   0x1   :  { %9 = vsyncpa [#allocation6], 0 }
   0x2   :  { %10 = vsyncpa [#allocation4], 0 }
   0x3   :  { %15 = vsyncadd [#allocation3], 768  ;;  %s2168_s12 = smov [#allocation5]  }
   0x4   :  { %s28_s13 = sshll.u32 %s2168_s12, 4  ;;  %s29_s13 = int_to_ptr.vmem [resolvable:$true] %s28_s13 }
   0x5   :  { %s2090_s14 = scalar_lea.vmem %s29_s13, 24576  ;;  %p2095_p1 = scmp.lt.s32.totalorder %s29_s13, %s29_s13 }
   0x6   :  { %p2091_p0 = scmp.ne.s32.totalorder %s29_s13, %s2090_s14  ;;  %p2096_p2 = scmp.lt.s32.totalorder %s2090_s14, %s2090_s14 }
   0x8   :  { %p2097_p3 = por %p2096_p2, %p2095_p1 }
   0xa   :  { %p2098_p4 = pnand %p2097_p3, %p2091_p0 }
   0xc   :  { %2101 = shalt.err (!%p2098_p4)
}
   0xd   :  { %s2169_s15 = smov 256   ;;  %s2170_s16 = smov 16  }
   0xe   :  { %34 = dma.hbm_to_vmem [thread:$0]  %s2251_s1, 24576, %s29_s13, [#allocation6], %s2169_s15, %s2169_s15, %s2170_s16  }
   0xf   :  { %s2171_s19 = smov [#allocation2]  }
  0x10   :  { %s16_s20 = sshll.u32 %s2171_s19, 4  ;;  %s17_s20 = int_to_ptr.vmem [resolvable:$true] %s16_s20 }
  0x11   :  { %s2110_s21 = scalar_lea.vmem %s17_s20, 768  ;;  %s2114_s22 = scalar_lea.vmem %s17_s20, 1536 }
  0x12   :  { %p2111_p5 = scmp.ne.s32.totalorder %s17_s20, %s2110_s21  ;;  %p2115_p6 = scmp.lt.s32.totalorder %s17_s20, %s17_s20 }
  0x13   :  { %p2116_p7 = scmp.lt.s32.totalorder %s2114_s22, %s2110_s21 }
  0x15   :  { %p2117_p8 = por %p2116_p7, %p2115_p6 }
  0x17   :  { %p2118_p9 = pnand %p2117_p8, %p2111_p5 }
  0x19   :  { %2121 = shalt.err (!%p2118_p9)
}
  0x1a   :  { %s2172_s23 = smov 768   ;;  %s2173_s24 = smov 48  }
  0x1b   :  { %22 = dma.hbm_to_vmem [thread:$0]  %s2250_s0, 768, %s17_s20, [#allocation3], %s2172_s23, %s2172_s23, %s2173_s24  }
  0x1c   :  { %s2174_s27 = smov [#allocation7]  }
  0x1d   :  { %s41_s28 = sshll.u32 %s2174_s27, 4  ;;  %s42_s28 = int_to_ptr.vmem [resolvable:$true] %s41_s28 }
  0x1e   :  { %s2130_s1 = scalar_lea.vmem %s42_s28, 64  ;;  %p2135_p11 = scmp.lt.s32.totalorder %s42_s28, %s42_s28 }
  0x1f   :  { %p2131_p10 = scmp.ne.s32.totalorder %s42_s28, %s2130_s1  ;;  %p2136_p12 = scmp.lt.s32.totalorder %s2130_s1, %s2130_s1 }
  0x21   :  { %p2137_p13 = por %p2136_p12, %p2135_p11 }
  0x23   :  { %p2138_p0 = pnand %p2137_p13, %p2131_p10 }
  0x25   :  { %2141 = shalt.err (!%p2138_p0)
}
  0x26   :  { %44 = dma.hbm_to_vmem [thread:$0]  %s2252_s2, 64, %s42_s28, [#allocation6]  }
  0x27   :  { %2162 = dma.done.wait [#allocation3], 1536  }
  0x28   :  { %2163 = vsyncadd [#allocation3], 4294965760 }
  0x29   :  { %2164 = dma.done.wait [#allocation6], 24640  }
  0x2a   :  { %2165 = vsyncadd [#allocation6], 4294942656  ;;  %v1786_v0 = vld [vmem:[#allocation5 + $0xe4] ss:$16 sps:$4 sm:$0xff]   ;;  %v1790_v2 = vld [vmem:[#allocation5 + $0xe0] ss:$16 sps:$4 sm:$0xff]  }
  0x2b   :  { %v1788_v1 = vld [vmem:[#allocation5 + $0x2e4] ss:$16 sps:$4 sm:$0xff]   ;;  %1246 = vmatprep.subr.bf16.mxu0 %v1786_v0  ;;  %v1791_v3 = vld [vmem:[#allocation5 + $0x2e0] ss:$16 sps:$4 sm:$0xff]   ;;  %v55_v46 = vld [vmem:[#allocation2 + $0x8] sm:$0xff] }
  0x2c   :  { %1289 = vmatprep.subr.bf16.mxu1 %v1788_v1  ;;  %v1792_v4 = vld [vmem:[#allocation5 + $0xc4] ss:$16 sps:$4 sm:$0xff]   ;;  %1247 = vmatpush1.bf16.msra.mxu0 %v1790_v2  ;;  %v1796_v6 = vld [vmem:[#allocation5 + $0xc0] ss:$16 sps:$4 sm:$0xff]   ;;  %v61_v47 = vld [vmem:[#allocation2 + $0x38] sm:$0xff] }
  0x2d   :  { %1290 = vmatpush1.bf16.msra.mxu1 %v1791_v3  ;;  %v1794_v5 = vld [vmem:[#allocation5 + $0x2c4] ss:$16 sps:$4 sm:$0xff]   ;;  %1248 = vmatprep.subr.bf16.mxu0 %v1792_v4  ;;  %v1797_v7 = vld [vmem:[#allocation5 + $0x2c0] ss:$16 sps:$4 sm:$0xff]   ;;  %v57_v48 = vld [vmem:[#allocation2 + $0x18] sm:$0xff]  ;;  %v67_v53 = vpack.c.bf16 %v61_v47, %v55_v46 }
  0x2e   :  { %1291 = vmatprep.subr.bf16.mxu1 %v1794_v5  ;;  %v1798_v8 = vld [vmem:[#allocation5 + $0xa4] ss:$16 sps:$4 sm:$0xff]   ;;  %v1802_v10 = vld [vmem:[#allocation5 + $0xa0] ss:$16 sps:$4 sm:$0xff]   ;;  %v63_v49 = vld [vmem:[#allocation2 + $0x48] sm:$0xff] }
  0x2f   :  { %v1800_v9 = vld [vmem:[#allocation5 + $0x2a4] ss:$16 sps:$4 sm:$0xff]   ;;  %v1803_v11 = vld [vmem:[#allocation5 + $0x2a0] ss:$16 sps:$4 sm:$0xff]   ;;  %v2207_v54 = vpack.c.bf16 %v63_v49, %v57_v48  ;;  %1278 = vmatprep.mubr.bf16.mxu0 %v67_v53  ;;  %v1927_v46 = vld [vmem:[#allocation5 + $0x8] ss:$16 sps:$4 sm:$0xff]  }
  0x30   :  { %1249 = vmatpush1.bf16.msra.mxu0 %v1796_v6  ;;  %v1804_v12 = vld [vmem:[#allocation5 + $0x84] ss:$16 sps:$4 sm:$0xff]   ;;  %v1808_v14 = vld [vmem:[#allocation5 + $0x80] ss:$16 sps:$4 sm:$0xff]   ;;  %v1935_v48 = vld [vmem:[#allocation5 + $0x1ec] ss:$16 sps:$4 sm:$0xff]  }
  0x31   :  { %1292 = vmatpush1.bf16.msra.mxu1 %v1797_v7  ;;  %1250 = vmatprep.subr.bf16.mxu0 %v1798_v8  ;;  %v1806_v13 = vld [vmem:[#allocation5 + $0x284] ss:$16 sps:$4 sm:$0xff]   ;;  %v1809_v15 = vld [vmem:[#allocation5 + $0x280] ss:$16 sps:$4 sm:$0xff]  }
  0x32   :  { %1293 = vmatprep.subr.bf16.mxu1 %v1800_v9  ;;  %v1810_v16 = vld [vmem:[#allocation5 + $0x64] ss:$16 sps:$4 sm:$0xff]   ;;  %v1814_v18 = vld [vmem:[#allocation5 + $0x60] ss:$16 sps:$4 sm:$0xff]   ;;  %1321 = vmatprep.mubr.bf16.mxu1 %v2207_v54 }
  0x33   :  { %v1812_v17 = vld [vmem:[#allocation5 + $0x264] ss:$16 sps:$4 sm:$0xff]   ;;  %v1815_v19 = vld [vmem:[#allocation5 + $0x260] ss:$16 sps:$4 sm:$0xff]  }
  0x34   :  { %1251 = vmatpush1.bf16.msra.mxu0 %v1802_v10  ;;  %v1816_v20 = vld [vmem:[#allocation5 + $0x44] ss:$16 sps:$4 sm:$0xff]   ;;  %v1820_v22 = vld [vmem:[#allocation5 + $0x40] ss:$16 sps:$4 sm:$0xff]  }
  0x35   :  { %1294 = vmatpush1.bf16.msra.mxu1 %v1803_v11  ;;  %1252 = vmatprep.subr.bf16.mxu0 %v1804_v12  ;;  %v1818_v21 = vld [vmem:[#allocation5 + $0x244] ss:$16 sps:$4 sm:$0xff]   ;;  %v1821_v23 = vld [vmem:[#allocation5 + $0x240] ss:$16 sps:$4 sm:$0xff]   ;;  %v1887_v11 = vld [vmem:[#allocation5 + $0xec] ss:$16 sps:$4 sm:$0xff]  }
  0x36   :  { %1295 = vmatprep.subr.bf16.mxu1 %v1806_v13  ;;  %v1822_v24 = vld [vmem:[#allocation5 + $0x24] ss:$16 sps:$4 sm:$0xff]   ;;  %v1826_v26 = vld [vmem:[#allocation5 + $0x20] ss:$16 sps:$4 sm:$0xff]  }
  0x37   :  { %v1824_v25 = vld [vmem:[#allocation5 + $0x224] ss:$16 sps:$4 sm:$0xff]   ;;  %v1827_v27 = vld [vmem:[#allocation5 + $0x220] ss:$16 sps:$4 sm:$0xff]  }
  0x38   :  { %1253 = vmatpush1.bf16.msra.mxu0 %v1808_v14  ;;  %v1828_v28 = vld [vmem:[#allocation5 + $0x4] ss:$16 sps:$4 sm:$0xff]   ;;  %v1832_v30 = vld [vmem:[#allocation5] ss:$16 sps:$4 sm:$0xff]  }
  0x39   :  { %1296 = vmatpush1.bf16.msra.mxu1 %v1809_v15  ;;  %1254 = vmatprep.subr.bf16.mxu0 %v1810_v16  ;;  %v1830_v29 = vld [vmem:[#allocation5 + $0x204] ss:$16 sps:$4 sm:$0xff]   ;;  %v1833_v31 = vld [vmem:[#allocation5 + $0x200] ss:$16 sps:$4 sm:$0xff]   ;;  %v1885_v15 = vld [vmem:[#allocation5 + $0xe8] ss:$16 sps:$4 sm:$0xff]  }
  0x3a   :  { %1297 = vmatprep.subr.bf16.mxu1 %v1812_v17  ;;  %v1834_v32 = vld [vmem:[#allocation5 + $0x1e4] ss:$16 sps:$4 sm:$0xff]   ;;  %v1838_v34 = vld [vmem:[#allocation5 + $0x1e0] ss:$16 sps:$4 sm:$0xff]   ;;  %v1893_v17 = vld [vmem:[#allocation5 + $0xcc] ss:$16 sps:$4 sm:$0xff]  }
  0x3b   :  { %v1836_v33 = vld [vmem:[#allocation5 + $0x3e4] ss:$16 sps:$4 sm:$0xff]   ;;  %v1839_v35 = vld [vmem:[#allocation5 + $0x3e0] ss:$16 sps:$4 sm:$0xff]  }
  0x3c   :  { %1255 = vmatpush1.bf16.msra.mxu0 %v1814_v18  ;;  %v1840_v36 = vld [vmem:[#allocation5 + $0x1c4] ss:$16 sps:$4 sm:$0xff]   ;;  %v1844_v38 = vld [vmem:[#allocation5 + $0x1c0] ss:$16 sps:$4 sm:$0xff]  }
  0x3d   :  { %1298 = vmatpush1.bf16.msra.mxu1 %v1815_v19  ;;  %1256 = vmatprep.subr.bf16.mxu0 %v1816_v20  ;;  %v1842_v37 = vld [vmem:[#allocation5 + $0x3c4] ss:$16 sps:$4 sm:$0xff]   ;;  %v1845_v39 = vld [vmem:[#allocation5 + $0x3c0] ss:$16 sps:$4 sm:$0xff]   ;;  %v1891_v19 = vld [vmem:[#allocation5 + $0xc8] ss:$16 sps:$4 sm:$0xff]  }
  0x3e   :  { %1299 = vmatprep.subr.bf16.mxu1 %v1818_v21  ;;  %v1846_v40 = vld [vmem:[#allocation5 + $0x1a4] ss:$16 sps:$4 sm:$0xff]   ;;  %v1850_v42 = vld [vmem:[#allocation5 + $0x1a0] ss:$16 sps:$4 sm:$0xff]   ;;  %v1899_v21 = vld [vmem:[#allocation5 + $0xac] ss:$16 sps:$4 sm:$0xff]  }
  0x3f   :  { %v1848_v41 = vld [vmem:[#allocation5 + $0x3a4] ss:$16 sps:$4 sm:$0xff]   ;;  %v1851_v43 = vld [vmem:[#allocation5 + $0x3a0] ss:$16 sps:$4 sm:$0xff]  }
  0x40   :  { %1257 = vmatpush1.bf16.msra.mxu0 %v1820_v22  ;;  %v1852_v44 = vld [vmem:[#allocation5 + $0x184] ss:$16 sps:$4 sm:$0xff]   ;;  %v1856_v50 = vld [vmem:[#allocation5 + $0x180] ss:$16 sps:$4 sm:$0xff]  }
  0x41   :  { %1300 = vmatpush1.bf16.msra.mxu1 %v1821_v23  ;;  %1258 = vmatprep.subr.bf16.mxu0 %v1822_v24  ;;  %v1854_v45 = vld [vmem:[#allocation5 + $0x384] ss:$16 sps:$4 sm:$0xff]   ;;  %v1857_v51 = vld [vmem:[#allocation5 + $0x380] ss:$16 sps:$4 sm:$0xff]   ;;  %v1897_v23 = vld [vmem:[#allocation5 + $0xa8] ss:$16 sps:$4 sm:$0xff]  }
  0x42   :  { %1301 = vmatprep.subr.bf16.mxu1 %v1824_v25  ;;  %v1858_v52 = vld [vmem:[#allocation5 + $0x164] ss:$16 sps:$4 sm:$0xff]   ;;  %v1862_v56 = vld [vmem:[#allocation5 + $0x160] ss:$16 sps:$4 sm:$0xff]   ;;  %v1905_v25 = vld [vmem:[#allocation5 + $0x8c] ss:$16 sps:$4 sm:$0xff]  }
  0x43   :  { %v1860_v55 = vld [vmem:[#allocation5 + $0x364] ss:$16 sps:$4 sm:$0xff]   ;;  %v1863_v57 = vld [vmem:[#allocation5 + $0x360] ss:$16 sps:$4 sm:$0xff]  }
  0x44   :  { %1259 = vmatpush1.bf16.msra.mxu0 %v1826_v26  ;;  %v1864_v58 = vld [vmem:[#allocation5 + $0x144] ss:$16 sps:$4 sm:$0xff]   ;;  %v1868_v60 = vld [vmem:[#allocation5 + $0x140] ss:$16 sps:$4 sm:$0xff]  }
  0x45   :  { %1302 = vmatpush1.bf16.msra.mxu1 %v1827_v27  ;;  %1260 = vmatprep.subr.bf16.mxu0 %v1828_v28  ;;  %v1866_v59 = vld [vmem:[#allocation5 + $0x344] ss:$16 sps:$4 sm:$0xff]   ;;  %v1869_v61 = vld [vmem:[#allocation5 + $0x340] ss:$16 sps:$4 sm:$0xff]   ;;  %v1903_v27 = vld [vmem:[#allocation5 + $0x88] ss:$16 sps:$4 sm:$0xff]  }
  0x46   :  { %1303 = vmatprep.subr.bf16.mxu1 %v1830_v29  ;;  %v1870_v62 = vld [vmem:[#allocation5 + $0x124] ss:$16 sps:$4 sm:$0xff]   ;;  %v1874_v0 = vld [vmem:[#allocation5 + $0x120] ss:$16 sps:$4 sm:$0xff]   ;;  %v1911_v29 = vld [vmem:[#allocation5 + $0x6c] ss:$16 sps:$4 sm:$0xff]  }
  0x47   :  { %v1872_v63 = vld [vmem:[#allocation5 + $0x324] ss:$16 sps:$4 sm:$0xff]   ;;  %v1875_v1 = vld [vmem:[#allocation5 + $0x320] ss:$16 sps:$4 sm:$0xff]  }
  0x48   :  { %1261 = vmatpush1.bf16.msra.mxu0 %v1832_v30  ;;  %v1876_v2 = vld [vmem:[#allocation5 + $0x104] ss:$16 sps:$4 sm:$0xff]   ;;  %v1880_v4 = vld [vmem:[#allocation5 + $0x100] ss:$16 sps:$4 sm:$0xff]  }
  0x49   :  { %1304 = vmatpush1.bf16.msra.mxu1 %v1833_v31  ;;  %1262 = vmatprep.subr.bf16.mxu0 %v1834_v32  ;;  %v1878_v3 = vld [vmem:[#allocation5 + $0x304] ss:$16 sps:$4 sm:$0xff]   ;;  %v1881_v5 = vld [vmem:[#allocation5 + $0x300] ss:$16 sps:$4 sm:$0xff]   ;;  %v1909_v31 = vld [vmem:[#allocation5 + $0x68] ss:$16 sps:$4 sm:$0xff]  }
  0x4a   :  { %1305 = vmatprep.subr.bf16.mxu1 %v1836_v33  ;;  %v54_v6 = vld [vmem:[#allocation2] sm:$0xff]  ;;  %v60_v7 = vld [vmem:[#allocation2 + $0x30] sm:$0xff]  ;;  %v1917_v33 = vld [vmem:[#allocation5 + $0x4c] ss:$16 sps:$4 sm:$0xff]  }
  0x4b   :  { %v56_v8 = vld [vmem:[#allocation2 + $0x10] sm:$0xff]  ;;  %v62_v9 = vld [vmem:[#allocation2 + $0x40] sm:$0xff]  ;;  %v2210_v12 = vpack.c.bf16 %v60_v7, %v54_v6  ;;  %v1963_v7 = vld [vmem:[#allocation5 + $0x148] ss:$16 sps:$4 sm:$0xff]  }
  0x4c   :  { %1263 = vmatpush2.bf16.msra.mxu0 %v1838_v34  ;;  %v1884_v10 = vld [vmem:[#allocation5 + $0x4e4] ss:$16 sps:$4 sm:$0xff]   ;;  %v2212_v13 = vpack.c.bf16 %v62_v9, %v56_v8  ;;  %v1882_v14 = vld [vmem:[#allocation5 + $0x4e0] ss:$16 sps:$4 sm:$0xff]   ;;  %v1971_v9 = vld [vmem:[#allocation5 + $0x12c] ss:$16 sps:$4 sm:$0xff]  }
  0x4d   :  { %1306 = vmatpush2.bf16.msra.mxu1 %v1839_v35  ;;  %1264 = vmatprep.subr.bf16.mxu0 %v1840_v36  ;;  %v1890_v16 = vld [vmem:[#allocation5 + $0x4c4] ss:$16 sps:$4 sm:$0xff]   ;;  %v1888_v18 = vld [vmem:[#allocation5 + $0x4c0] ss:$16 sps:$4 sm:$0xff]   ;;  %v1915_v35 = vld [vmem:[#allocation5 + $0x48] ss:$16 sps:$4 sm:$0xff]  }
  0x4e   :  { %1307 = vmatprep.subr.bf16.mxu1 %v1842_v37  ;;  %v1896_v20 = vld [vmem:[#allocation5 + $0x4a4] ss:$16 sps:$4 sm:$0xff]   ;;  %v1894_v22 = vld [vmem:[#allocation5 + $0x4a0] ss:$16 sps:$4 sm:$0xff]   ;;  %v1923_v37 = vld [vmem:[#allocation5 + $0x2c] ss:$16 sps:$4 sm:$0xff]  }
  0x4f   :  { %v1902_v24 = vld [vmem:[#allocation5 + $0x484] ss:$16 sps:$4 sm:$0xff]   ;;  %v1900_v26 = vld [vmem:[#allocation5 + $0x480] ss:$16 sps:$4 sm:$0xff]  }
  0x50   :  { %1265 = vmatpush2.bf16.msra.mxu0 %v1844_v38  ;;  %v1908_v28 = vld [vmem:[#allocation5 + $0x464] ss:$16 sps:$4 sm:$0xff]   ;;  %v1906_v30 = vld [vmem:[#allocation5 + $0x460] ss:$16 sps:$4 sm:$0xff]  }
  0x51   :  { %1308 = vmatpush2.bf16.msra.mxu1 %v1845_v39  ;;  %1266 = vmatprep.subr.bf16.mxu0 %v1846_v40  ;;  %v1914_v32 = vld [vmem:[#allocation5 + $0x444] ss:$16 sps:$4 sm:$0xff]   ;;  %v1912_v34 = vld [vmem:[#allocation5 + $0x440] ss:$16 sps:$4 sm:$0xff]   ;;  %v1921_v39 = vld [vmem:[#allocation5 + $0x28] ss:$16 sps:$4 sm:$0xff]  }
  0x52   :  { %1309 = vmatprep.subr.bf16.mxu1 %v1848_v41  ;;  %v1920_v36 = vld [vmem:[#allocation5 + $0x424] ss:$16 sps:$4 sm:$0xff]   ;;  %v1918_v38 = vld [vmem:[#allocation5 + $0x420] ss:$16 sps:$4 sm:$0xff]   ;;  %v59_v41 = vld [vmem:[#allocation2 + $0x28] sm:$0xff] }
  0x53   :  { %v1926_v40 = vld [vmem:[#allocation5 + $0x404] ss:$16 sps:$4 sm:$0xff]   ;;  %v1930_v49 = vld [vmem:[#allocation5 + $0x5e0] ss:$16 sps:$4 sm:$0xff]  }
  0x54   :  { %1267 = vmatpush2.bf16.msra.mxu0 %v1850_v42  ;;  %v65_v42 = vld [vmem:[#allocation2 + $0x58] sm:$0xff]  ;;  %v1932_v47 = vld [vmem:[#allocation5 + $0x5e4] ss:$16 sps:$4 sm:$0xff]   ;;  %v1960_v6 = vld [vmem:[#allocation5 + $0x540] ss:$16 sps:$4 sm:$0xff]  }
  0x55   :  { %1310 = vmatpush2.bf16.msra.mxu1 %v1851_v43  ;;  %1268 = vmatprep.subr.bf16.mxu0 %v1852_v44  ;;  %v1929_v43 = vld [vmem:[#allocation5 + $0xc] ss:$16 sps:$4 sm:$0xff]   ;;  %v2216_v44 = vpack.c.bf16 %v65_v42, %v59_v41  ;;  %v1968_v8 = vld [vmem:[#allocation5 + $0x524] ss:$16 sps:$4 sm:$0xff]   ;;  %v2008_v41 = vld [vmem:[#allocation5 + $0x248] ss:$16 sps:$4 sm:$0xff]  }
  0x56   :  { %1311 = vmatprep.subr.bf16.mxu1 %v1854_v45  ;;  %v1924_v45 = vld [vmem:[#allocation5 + $0x400] ss:$16 sps:$4 sm:$0xff]   ;;  %v2011_v42 = vld [vmem:[#allocation5 + $0x448] ss:$16 sps:$4 sm:$0xff]  }
  0x58   :  { %1269 = vmatpush2.bf16.msra.mxu0 %v1856_v50  ;;  %v1933_v50 = vld [vmem:[#allocation5 + $0x1e8] ss:$16 sps:$4 sm:$0xff]  }
  0x59   :  { %1312 = vmatpush2.bf16.msra.mxu1 %v1857_v51  ;;  %1270 = vmatprep.subr.bf16.mxu0 %v1858_v52  ;;  %v1938_v51 = vld [vmem:[#allocation5 + $0x5c4] ss:$16 sps:$4 sm:$0xff]   ;;  %v1941_v52 = vld [vmem:[#allocation5 + $0x1cc] ss:$16 sps:$4 sm:$0xff]  }
  0x5a   :  { %1313 = vmatprep.subr.bf16.mxu1 %v1860_v55  ;;  %v1939_v55 = vld [vmem:[#allocation5 + $0x1c8] ss:$16 sps:$4 sm:$0xff]  }
  0x5c   :  { %1271 = vmatpush2.bf16.msra.mxu0 %v1862_v56  ;;  %v1944_v56 = vld [vmem:[#allocation5 + $0x5a4] ss:$16 sps:$4 sm:$0xff]  }
  0x5d   :  { %1314 = vmatpush2.bf16.msra.mxu1 %v1863_v57  ;;  %1272 = vmatprep.subr.bf16.mxu0 %v1864_v58  ;;  %v1947_v57 = vld [vmem:[#allocation5 + $0x1ac] ss:$16 sps:$4 sm:$0xff]   ;;  %v1942_v58 = vld [vmem:[#allocation5 + $0x5a0] ss:$16 sps:$4 sm:$0xff]  }
  0x5e   :  { %1315 = vmatprep.subr.bf16.mxu1 %v1866_v59  ;;  %v1945_v59 = vld [vmem:[#allocation5 + $0x1a8] ss:$16 sps:$4 sm:$0xff]  }
  0x60   :  { %1273 = vmatpush2.bf16.msra.mxu0 %v1868_v60  ;;  %v1950_v60 = vld [vmem:[#allocation5 + $0x584] ss:$16 sps:$4 sm:$0xff]  }
  0x61   :  { %1316 = vmatpush2.bf16.msra.mxu1 %v1869_v61  ;;  %1274 = vmatprep.subr.bf16.mxu0 %v1870_v62  ;;  %v1953_v61 = vld [vmem:[#allocation5 + $0x18c] ss:$16 sps:$4 sm:$0xff]   ;;  %v1948_v62 = vld [vmem:[#allocation5 + $0x580] ss:$16 sps:$4 sm:$0xff]  }
  0x62   :  { %1317 = vmatprep.subr.bf16.mxu1 %v1872_v63  ;;  %v1951_v63 = vld [vmem:[#allocation5 + $0x188] ss:$16 sps:$4 sm:$0xff]  }
  0x64   :  { %1275 = vmatpush2.bf16.msra.mxu0 %v1874_v0  ;;  %v1956_v0 = vld [vmem:[#allocation5 + $0x564] ss:$16 sps:$4 sm:$0xff]  }
  0x65   :  { %1318 = vmatpush2.bf16.msra.mxu1 %v1875_v1  ;;  %1276 = vmatprep.subr.bf16.mxu0 %v1876_v2  ;;  %v1959_v1 = vld [vmem:[#allocation5 + $0x16c] ss:$16 sps:$4 sm:$0xff]   ;;  %v1954_v2 = vld [vmem:[#allocation5 + $0x560] ss:$16 sps:$4 sm:$0xff]  }
  0x66   :  { %1319 = vmatprep.subr.bf16.mxu1 %v1878_v3  ;;  %v1957_v3 = vld [vmem:[#allocation5 + $0x168] ss:$16 sps:$4 sm:$0xff]  }
  0x68   :  { %1277 = vmatpush2.bf16.msra.mxu0 %v1880_v4  ;;  %v1962_v4 = vld [vmem:[#allocation5 + $0x544] ss:$16 sps:$4 sm:$0xff]  }
  0x69   :  { %1320 = vmatpush2.bf16.msra.mxu1 %v1881_v5  ;;  %1332 = vmatprep.subr.bf16.mxu0 %v1884_v10  ;;  %v1965_v5 = vld [vmem:[#allocation5 + $0x14c] ss:$16 sps:$4 sm:$0xff]   ;;  %v1966_v10 = vld [vmem:[#allocation5 + $0x520] ss:$16 sps:$4 sm:$0xff]  }
  0x6a   :  { %1375 = vmatprep.subr.bf16.mxu1 %v1887_v11  ;;  %v1969_v11 = vld [vmem:[#allocation5 + $0x128] ss:$16 sps:$4 sm:$0xff]  }
  0x6b   :  { %1279 = vmatmul.mubr.bf16.vlgmr.msra.gmra.mxu0 %v2210_v12 }
  0x6c   :  { %1322 = vmatmul.mubr.bf16.vlgmr.msra.gmra.mxu1 %v2212_v13  ;;  %1333 = vmatpush1.bf16.msra.mxu0 %v1882_v14  ;;  %v1974_v14 = vld [vmem:[#allocation5 + $0x504] ss:$16 sps:$4 sm:$0xff]  }
  0x6d   :  { %1376 = vmatpush1.bf16.msra.mxu1 %v1885_v15  ;;  %1334 = vmatprep.subr.bf16.mxu0 %v1890_v16  ;;  %v1977_v15 = vld [vmem:[#allocation5 + $0x10c] ss:$16 sps:$4 sm:$0xff]   ;;  %v1972_v16 = vld [vmem:[#allocation5 + $0x500] ss:$16 sps:$4 sm:$0xff]  }
  0x6e   :  { %1377 = vmatprep.subr.bf16.mxu1 %v1893_v17  ;;  %1407 = vmatprep.mubr.bf16.mxu1 %v67_v53  ;;  %v1936_v53 = vld [vmem:[#allocation5 + $0x5c0] ss:$16 sps:$4 sm:$0xff]   ;;  %v1975_v17 = vld [vmem:[#allocation5 + $0x108] ss:$16 sps:$4 sm:$0xff]  }
  0x6f   :  { %1364 = vmatprep.mubr.bf16.mxu0 %v2216_v44 }
  0x70   :  { %1335 = vmatpush1.bf16.msra.mxu0 %v1888_v18  ;;  %v58_v18 = vld [vmem:[#allocation2 + $0x20] sm:$0xff] }
  0x71   :  { %1378 = vmatpush1.bf16.msra.mxu1 %v1891_v19  ;;  %1336 = vmatprep.subr.bf16.mxu0 %v1896_v20  ;;  %v64_v19 = vld [vmem:[#allocation2 + $0x50] sm:$0xff]  ;;  %v1980_v20 = vld [vmem:[#allocation5 + $0x2ec] ss:$16 sps:$4 sm:$0xff]  }
  0x72   :  { %1379 = vmatprep.subr.bf16.mxu1 %v1899_v21  ;;  %v1983_v21 = vld [vmem:[#allocation5 + $0x4ec] ss:$16 sps:$4 sm:$0xff]  }
  0x74   :  { %1337 = vmatpush1.bf16.msra.mxu0 %v1894_v22  ;;  %v2219_v22 = vpack.c.bf16 %v64_v19, %v58_v18  ;;  %v2070_v18 = vld [vmem:[#allocation5 + $0x30c] ss:$16 sps:$4 sm:$0xff]  }
  0x75   :  { %1380 = vmatpush1.bf16.msra.mxu1 %v1897_v23  ;;  %1338 = vmatprep.subr.bf16.mxu0 %v1902_v24  ;;  %v1978_v23 = vld [vmem:[#allocation5 + $0x2e8] ss:$16 sps:$4 sm:$0xff]   ;;  %v2073_v19 = vld [vmem:[#allocation5 + $0x50c] ss:$16 sps:$4 sm:$0xff]  }
  0x76   :  { %1381 = vmatprep.subr.bf16.mxu1 %v1905_v25  ;;  %v1981_v24 = vld [vmem:[#allocation5 + $0x4e8] ss:$16 sps:$4 sm:$0xff]   ;;  %v1986_v25 = vld [vmem:[#allocation5 + $0x2cc] ss:$16 sps:$4 sm:$0xff]  }
  0x78   :  { %1339 = vmatpush1.bf16.msra.mxu0 %v1900_v26  ;;  %v1989_v26 = vld [vmem:[#allocation5 + $0x4cc] ss:$16 sps:$4 sm:$0xff]  }
  0x79   :  { %1382 = vmatpush1.bf16.msra.mxu1 %v1903_v27  ;;  %1340 = vmatprep.subr.bf16.mxu0 %v1908_v28  ;;  %v1984_v27 = vld [vmem:[#allocation5 + $0x2c8] ss:$16 sps:$4 sm:$0xff]  }
  0x7a   :  { %1383 = vmatprep.subr.bf16.mxu1 %v1911_v29  ;;  %v1987_v28 = vld [vmem:[#allocation5 + $0x4c8] ss:$16 sps:$4 sm:$0xff]   ;;  %v1992_v29 = vld [vmem:[#allocation5 + $0x2ac] ss:$16 sps:$4 sm:$0xff]  }
  0x7c   :  { %1341 = vmatpush1.bf16.msra.mxu0 %v1906_v30  ;;  %v1995_v30 = vld [vmem:[#allocation5 + $0x4ac] ss:$16 sps:$4 sm:$0xff]  }
  0x7d   :  { %1384 = vmatpush1.bf16.msra.mxu1 %v1909_v31  ;;  %1342 = vmatprep.subr.bf16.mxu0 %v1914_v32  ;;  %v1990_v31 = vld [vmem:[#allocation5 + $0x2a8] ss:$16 sps:$4 sm:$0xff]  }
  0x7e   :  { %1385 = vmatprep.subr.bf16.mxu1 %v1917_v33  ;;  %v1993_v32 = vld [vmem:[#allocation5 + $0x4a8] ss:$16 sps:$4 sm:$0xff]   ;;  %v1998_v33 = vld [vmem:[#allocation5 + $0x28c] ss:$16 sps:$4 sm:$0xff]  }
  0x80   :  { %1343 = vmatpush1.bf16.msra.mxu0 %v1912_v34  ;;  %v1996_v34 = vld [vmem:[#allocation5 + $0x288] ss:$16 sps:$4 sm:$0xff]  }
  0x81   :  { %1386 = vmatpush1.bf16.msra.mxu1 %v1915_v35  ;;  %1344 = vmatprep.subr.bf16.mxu0 %v1920_v36  ;;  %v1999_v35 = vld [vmem:[#allocation5 + $0x488] ss:$16 sps:$4 sm:$0xff]   ;;  %v2004_v36 = vld [vmem:[#allocation5 + $0x26c] ss:$16 sps:$4 sm:$0xff]  }
  0x82   :  { %1387 = vmatprep.subr.bf16.mxu1 %v1923_v37  ;;  %v2007_v37 = vld [vmem:[#allocation5 + $0x46c] ss:$16 sps:$4 sm:$0xff]  }
  0x84   :  { %1345 = vmatpush1.bf16.msra.mxu0 %v1918_v38  ;;  %v2005_v38 = vld [vmem:[#allocation5 + $0x468] ss:$16 sps:$4 sm:$0xff]  }
  0x85   :  { %1388 = vmatpush1.bf16.msra.mxu1 %v1921_v39  ;;  %1346 = vmatprep.subr.bf16.mxu0 %v1926_v40  ;;  %v2010_v39 = vld [vmem:[#allocation5 + $0x24c] ss:$16 sps:$4 sm:$0xff]  }
  0x86   :  { %1389 = vmatprep.subr.bf16.mxu1 %v1929_v43  ;;  %v2013_v40 = vld [vmem:[#allocation5 + $0x44c] ss:$16 sps:$4 sm:$0xff]  }
  0x87   :  { %v2016_v43 = vld [vmem:[#allocation5 + $0x22c] ss:$16 sps:$4 sm:$0xff]  }
  0x88   :  { %1347 = vmatpush1.bf16.msra.mxu0 %v1924_v45  ;;  %v2014_v45 = vld [vmem:[#allocation5 + $0x228] ss:$16 sps:$4 sm:$0xff]  }
  0x89   :  { %1390 = vmatpush1.bf16.msra.mxu1 %v1927_v46  ;;  %1348 = vmatprep.subr.bf16.mxu0 %v1932_v47  ;;  %v2017_v46 = vld [vmem:[#allocation5 + $0x428] ss:$16 sps:$4 sm:$0xff]   ;;  %v2022_v47 = vld [vmem:[#allocation5 + $0x20c] ss:$16 sps:$4 sm:$0xff]  }
  0x8a   :  { %1391 = vmatprep.subr.bf16.mxu1 %v1935_v48  ;;  %v2025_v48 = vld [vmem:[#allocation5 + $0x40c] ss:$16 sps:$4 sm:$0xff]  }
  0x8c   :  { %1349 = vmatpush2.bf16.msra.mxu0 %v1930_v49  ;;  %v2020_v49 = vld [vmem:[#allocation5 + $0x208] ss:$16 sps:$4 sm:$0xff]  }
  0x8d   :  { %1392 = vmatpush2.bf16.msra.mxu1 %v1933_v50  ;;  %1350 = vmatprep.subr.bf16.mxu0 %v1938_v51  ;;  %v2023_v50 = vld [vmem:[#allocation5 + $0x408] ss:$16 sps:$4 sm:$0xff]   ;;  %v2028_v51 = vld [vmem:[#allocation5 + $0x3ec] ss:$16 sps:$4 sm:$0xff]  }
  0x8e   :  { %1393 = vmatprep.subr.bf16.mxu1 %v1941_v52  ;;  %v2031_v52 = vld [vmem:[#allocation5 + $0x5ec] ss:$16 sps:$4 sm:$0xff]  }
  0x90   :  { %1351 = vmatpush2.bf16.msra.mxu0 %v1936_v53  ;;  %v2026_v53 = vld [vmem:[#allocation5 + $0x3e8] ss:$16 sps:$4 sm:$0xff]  }
  0x91   :  { %1394 = vmatpush2.bf16.msra.mxu1 %v1939_v55  ;;  %1352 = vmatprep.subr.bf16.mxu0 %v1944_v56  ;;  %v2029_v55 = vld [vmem:[#allocation5 + $0x5e8] ss:$16 sps:$4 sm:$0xff]   ;;  %v2034_v56 = vld [vmem:[#allocation5 + $0x3cc] ss:$16 sps:$4 sm:$0xff]  }
  0x92   :  { %1395 = vmatprep.subr.bf16.mxu1 %v1947_v57  ;;  %v2037_v57 = vld [vmem:[#allocation5 + $0x5cc] ss:$16 sps:$4 sm:$0xff]  }
  0x94   :  { %1353 = vmatpush2.bf16.msra.mxu0 %v1942_v58  ;;  %v2032_v58 = vld [vmem:[#allocation5 + $0x3c8] ss:$16 sps:$4 sm:$0xff]  }
  0x95   :  { %1396 = vmatpush2.bf16.msra.mxu1 %v1945_v59  ;;  %1354 = vmatprep.subr.bf16.mxu0 %v1950_v60  ;;  %v2035_v59 = vld [vmem:[#allocation5 + $0x5c8] ss:$16 sps:$4 sm:$0xff]   ;;  %v2040_v60 = vld [vmem:[#allocation5 + $0x3ac] ss:$16 sps:$4 sm:$0xff]  }
  0x96   :  { %1397 = vmatprep.subr.bf16.mxu1 %v1953_v61  ;;  %v2043_v61 = vld [vmem:[#allocation5 + $0x5ac] ss:$16 sps:$4 sm:$0xff]  }
  0x98   :  { %1355 = vmatpush2.bf16.msra.mxu0 %v1948_v62  ;;  %v2038_v62 = vld [vmem:[#allocation5 + $0x3a8] ss:$16 sps:$4 sm:$0xff]  }
  0x99   :  { %1398 = vmatpush2.bf16.msra.mxu1 %v1951_v63  ;;  %1356 = vmatprep.subr.bf16.mxu0 %v1956_v0  ;;  %v2041_v63 = vld [vmem:[#allocation5 + $0x5a8] ss:$16 sps:$4 sm:$0xff]   ;;  %v2046_v0 = vld [vmem:[#allocation5 + $0x38c] ss:$16 sps:$4 sm:$0xff]  }
  0x9a   :  { %1399 = vmatprep.subr.bf16.mxu1 %v1959_v1  ;;  %v2049_v1 = vld [vmem:[#allocation5 + $0x58c] ss:$16 sps:$4 sm:$0xff]  }
  0x9c   :  { %1357 = vmatpush2.bf16.msra.mxu0 %v1954_v2  ;;  %v2044_v2 = vld [vmem:[#allocation5 + $0x388] ss:$16 sps:$4 sm:$0xff]  }
  0x9d   :  { %1400 = vmatpush2.bf16.msra.mxu1 %v1957_v3  ;;  %1358 = vmatprep.subr.bf16.mxu0 %v1962_v4  ;;  %v2047_v3 = vld [vmem:[#allocation5 + $0x588] ss:$16 sps:$4 sm:$0xff]   ;;  %v2052_v4 = vld [vmem:[#allocation5 + $0x36c] ss:$16 sps:$4 sm:$0xff]  }
  0x9e   :  { %1401 = vmatprep.subr.bf16.mxu1 %v1965_v5  ;;  %v2055_v5 = vld [vmem:[#allocation5 + $0x56c] ss:$16 sps:$4 sm:$0xff]  }
  0xa0   :  { %1359 = vmatpush2.bf16.msra.mxu0 %v1960_v6  ;;  %v2050_v6 = vld [vmem:[#allocation5 + $0x368] ss:$16 sps:$4 sm:$0xff]  }
  0xa1   :  { %1402 = vmatpush2.bf16.msra.mxu1 %v1963_v7  ;;  %1360 = vmatprep.subr.bf16.mxu0 %v1968_v8  ;;  %v2053_v7 = vld [vmem:[#allocation5 + $0x568] ss:$16 sps:$4 sm:$0xff]   ;;  %v2058_v8 = vld [vmem:[#allocation5 + $0x34c] ss:$16 sps:$4 sm:$0xff]  }
  0xa2   :  { %1403 = vmatprep.subr.bf16.mxu1 %v1971_v9  ;;  %v2061_v9 = vld [vmem:[#allocation5 + $0x54c] ss:$16 sps:$4 sm:$0xff]  }
  0xa4   :  { %1361 = vmatpush2.bf16.msra.mxu0 %v1966_v10  ;;  %v2056_v10 = vld [vmem:[#allocation5 + $0x348] ss:$16 sps:$4 sm:$0xff]  }
  0xa5   :  { %1404 = vmatpush2.bf16.msra.mxu1 %v1969_v11  ;;  %1362 = vmatprep.subr.bf16.mxu0 %v1974_v14  ;;  %v2059_v11 = vld [vmem:[#allocation5 + $0x548] ss:$16 sps:$4 sm:$0xff]   ;;  %v2064_v14 = vld [vmem:[#allocation5 + $0x32c] ss:$16 sps:$4 sm:$0xff]  }
  0xa6   :  { %1405 = vmatprep.subr.bf16.mxu1 %v1977_v15  ;;  %v2067_v15 = vld [vmem:[#allocation5 + $0x52c] ss:$16 sps:$4 sm:$0xff]  }
  0xa8   :  { %1363 = vmatpush2.bf16.msra.mxu0 %v1972_v16  ;;  %v2062_v16 = vld [vmem:[#allocation5 + $0x328] ss:$16 sps:$4 sm:$0xff]  }
  0xa9   :  { %1406 = vmatpush2.bf16.msra.mxu1 %v1975_v17  ;;  %1418 = vmatprep.subr.bf16.mxu0 %v1980_v20  ;;  %v2065_v17 = vld [vmem:[#allocation5 + $0x528] ss:$16 sps:$4 sm:$0xff]  }
  0xaa   :  { %1461 = vmatprep.subr.bf16.mxu1 %v1983_v21  ;;  %v2068_v20 = vld [vmem:[#allocation5 + $0x308] ss:$16 sps:$4 sm:$0xff]  }
  0xab   :  { %1365 = vmatmul.mubr.bf16.vlgmr.msra.gmra.mxu0 %v2219_v22  ;;  %v2071_v21 = vld [vmem:[#allocation5 + $0x508] ss:$16 sps:$4 sm:$0xff]  }
  0xac   :  { %1408 = vmatmul.mubr.bf16.vlgmr.msra.gmra.mxu1 %v2210_v12  ;;  %1419 = vmatpush1.bf16.msra.mxu0 %v1978_v23  ;;  %v2001_v12 = vld [vmem:[#allocation5 + $0x48c] ss:$16 sps:$4 sm:$0xff]  }
  0xad   :  { %1462 = vmatpush1.bf16.msra.mxu1 %v1981_v24  ;;  %1420 = vmatprep.subr.bf16.mxu0 %v1986_v25  ;;  %v266_v24 = vlaneseq }
  0xae   :  { %1463 = vmatprep.subr.bf16.mxu1 %v1989_v26  ;;  %1450 = vmatprep.mubr.bf16.mxu0 %v2207_v54  ;;  %v2002_v54 = vld [vmem:[#allocation5 + $0x268] ss:$16 sps:$4 sm:$0xff]  }
  0xaf   :  { %1493 = vmatprep.mubr.bf16.mxu1 %v2216_v44  ;;  %v2019_v44 = vld [vmem:[#allocation5 + $0x42c] ss:$16 sps:$4 sm:$0xff]  }
  0xb0   :  { %1421 = vmatpush1.bf16.msra.mxu0 %v1984_v27  ;;  %v267_v27 = vshrl.u32 %v266_v24, 7 }
  0xb1   :  { %1464 = vmatpush1.bf16.msra.mxu1 %v1987_v28  ;;  %1422 = vmatprep.subr.bf16.mxu0 %v1992_v29 }
  0xb2   :  { %1465 = vmatprep.subr.bf16.mxu1 %v1995_v30  ;;  %v272_v30 = vsub.s32 1, %v267_v27 }
  0xb4   :  { %1423 = vmatpush1.bf16.msra.mxu0 %v1990_v31 }
  0xb5   :  { %1466 = vmatpush1.bf16.msra.mxu1 %v1993_v32  ;;  %1424 = vmatprep.subr.bf16.mxu0 %v1998_v33  ;;  %v264_v32 = vld [vmem:[#allocation7] sm:$0xf] }
  0xb6   :  { %1467 = vmatprep.subr.bf16.mxu1 %v2001_v12  ;;  %v268_v12 = vsub.s32 0, %v267_v27 }
  0xb8   :  { %1425 = vmatpush1.bf16.msra.mxu0 %v1996_v34 }
  0xb9   :  { %1468 = vmatpush1.bf16.msra.mxu1 %v1999_v35  ;;  %1426 = vmatprep.subr.bf16.mxu0 %v2004_v36  ;;  %v273_v35 = vrot.slane %v264_v32, %v272_v30 }
  0xba   :  { %1469 = vmatprep.subr.bf16.mxu1 %v2007_v37  ;;  %v269_v37 = vrot.slane %v264_v32, %v268_v12 }
  0xbc   :  { %1427 = vmatpush1.bf16.msra.mxu0 %v2002_v54 }
  0xbd   :  { %1470 = vmatpush1.bf16.msra.mxu1 %v2005_v38  ;;  %1428 = vmatprep.subr.bf16.mxu0 %v2010_v39 }
  0xbe   :  { %1471 = vmatprep.subr.bf16.mxu1 %v2013_v40  ;;  %v276_v40 = vsub.s32 2, %v267_v27 }
  0xc0   :  { %1429 = vmatpush1.bf16.msra.mxu0 %v2008_v41 }
  0xc1   :  { %1472 = vmatpush1.bf16.msra.mxu1 %v2011_v42  ;;  %1430 = vmatprep.subr.bf16.mxu0 %v2016_v43 }
  0xc2   :  { %1473 = vmatprep.subr.bf16.mxu1 %v2019_v44  ;;  %v280_v44 = vsub.s32 3, %v267_v27 }
  0xc4   :  { %1431 = vmatpush1.bf16.msra.mxu0 %v2014_v45 }
  0xc5   :  { %1474 = vmatpush1.bf16.msra.mxu1 %v2017_v46  ;;  %1432 = vmatprep.subr.bf16.mxu0 %v2022_v47 }
  0xc6   :  { %1475 = vmatprep.subr.bf16.mxu1 %v2025_v48 }
  0xc8   :  { %1433 = vmatpush1.bf16.msra.mxu0 %v2020_v49  ;;  %v277_v49 = vrot.slane %v264_v32, %v276_v40 }
  0xc9   :  { %1476 = vmatpush1.bf16.msra.mxu1 %v2023_v50  ;;  %1434 = vmatprep.subr.bf16.mxu0 %v2028_v51 }
  0xca   :  { %1477 = vmatprep.subr.bf16.mxu1 %v2031_v52 }
  0xcc   :  { %1435 = vmatpush2.bf16.msra.mxu0 %v2026_v53  ;;  %v281_v53 = vrot.slane %v264_v32, %v280_v44 }
  0xcd   :  { %1478 = vmatpush2.bf16.msra.mxu1 %v2029_v55  ;;  %1436 = vmatprep.subr.bf16.mxu0 %v2034_v56 }
  0xce   :  { %1479 = vmatprep.subr.bf16.mxu1 %v2037_v57 }
  0xd0   :  { %1437 = vmatpush2.bf16.msra.mxu0 %v2032_v58 }
  0xd1   :  { %1480 = vmatpush2.bf16.msra.mxu1 %v2035_v59  ;;  %1438 = vmatprep.subr.bf16.mxu0 %v2040_v60 }
  0xd2   :  { %1481 = vmatprep.subr.bf16.mxu1 %v2043_v61 }
  0xd4   :  { %1439 = vmatpush2.bf16.msra.mxu0 %v2038_v62 }
  0xd5   :  { %1482 = vmatpush2.bf16.msra.mxu1 %v2041_v63  ;;  %1440 = vmatprep.subr.bf16.mxu0 %v2046_v0 }
  0xd6   :  { %1483 = vmatprep.subr.bf16.mxu1 %v2049_v1 }
  0xd8   :  { %1441 = vmatpush2.bf16.msra.mxu0 %v2044_v2 }
  0xd9   :  { %1484 = vmatpush2.bf16.msra.mxu1 %v2047_v3  ;;  %1442 = vmatprep.subr.bf16.mxu0 %v2052_v4 }
  0xda   :  { %1485 = vmatprep.subr.bf16.mxu1 %v2055_v5 }
  0xdc   :  { %1443 = vmatpush2.bf16.msra.mxu0 %v2050_v6 }
  0xdd   :  { %1486 = vmatpush2.bf16.msra.mxu1 %v2053_v7  ;;  %1444 = vmatprep.subr.bf16.mxu0 %v2058_v8 }
  0xde   :  { %1487 = vmatprep.subr.bf16.mxu1 %v2061_v9 }
  0xe0   :  { %1445 = vmatpush2.bf16.msra.mxu0 %v2056_v10 }
  0xe1   :  { %1488 = vmatpush2.bf16.msra.mxu1 %v2059_v11  ;;  %1446 = vmatprep.subr.bf16.mxu0 %v2064_v14 }
  0xe2   :  { %1489 = vmatprep.subr.bf16.mxu1 %v2067_v15 }
  0xe4   :  { %1447 = vmatpush2.bf16.msra.mxu0 %v2062_v16 }
  0xe5   :  { %1490 = vmatpush2.bf16.msra.mxu1 %v2065_v17  ;;  %1448 = vmatprep.subr.bf16.mxu0 %v2070_v18 }
  0xe6   :  { %1491 = vmatprep.subr.bf16.mxu1 %v2073_v19 }
  0xe8   :  { %1449 = vmatpush2.bf16.msra.mxu0 %v2068_v20 }
  0xe9   :  { %1492 = vmatpush2.bf16.msra.mxu1 %v2071_v21 }
  0xeb   :  { %1451 = vmatmul.mubr.bf16.vlgmr.msra.gmra.mxu0 %v2212_v13 }
  0xec   :  { %1494 = vmatmul.mubr.bf16.vlgmr.msra.gmra.mxu1 %v2219_v22 }
 0x12b   :  { %v1280_v23 = vpop.f32.mrf.mxu0 }
 0x12c   :  { %v1323_v25 = vpop.f32.mrf.mxu1  ;;  %v1281_v22 = vadd.f32 %v1280_v23, %v269_v37 }
 0x12d   :  { %v1282_v26 = vpop.f32.mrf.mxu0 }
 0x12e   :  { %v1325_v28 = vpop.f32.mrf.mxu1  ;;  %v1283_v38 = vadd.f32 %v1282_v26, %v273_v35  ;;  %v1324_v45 = vadd.f32 %v1323_v25, %v1281_v22 }
 0x12f   :  { %v1284_v29 = vpop.f32.mrf.mxu0 }
 0x130   :  { %v1327_v31 = vpop.f32.mrf.mxu1  ;;  %v1326_v42 = vadd.f32 %v1325_v28, %v1283_v38  ;;  %v1285_v46 = vadd.f32 %v1284_v29, %v269_v37 }
 0x131   :  { %v1286_v33 = vpop.f32.mrf.mxu0 }
 0x132   :  { %v1329_v36 = vpop.f32.mrf.mxu1  ;;  %v1287_v43 = vadd.f32 %v1286_v33, %v273_v35  ;;  %v1328_v55 = vadd.f32 %v1327_v31, %v1285_v46 }
 0x134   :  { %v1330_v51 = vadd.f32 %v1329_v36, %v1287_v43 }
 0x16b   :  { %v1366_v34 = vpop.f32.mrf.mxu0 }
 0x16c   :  { %v1409_v54 = vpop.f32.mrf.mxu1  ;;  %v1367_v52 = vadd.f32 %v1366_v34, %v1324_v45 }
 0x16d   :  { %v1368_v13 = vpop.f32.mrf.mxu0  ;;  %v1410_v59 = vadd.f32 %v1409_v54, %v277_v49 }
 0x16e   :  { %v1411_v39 = vpop.f32.mrf.mxu1  ;;  %v1369_v47 = vadd.f32 %v1368_v13, %v1326_v42  ;;  %v2229_v60 = vmax.f32 %v1367_v52, 0.0 }
 0x16f   :  { %v1370_v41 = vpop.f32.mrf.mxu0  ;;  %v1412_v0 = vadd.f32 %v1411_v39, %v281_v53 }
 0x170   :  { %v1413_v48 = vpop.f32.mrf.mxu1  ;;  %v2227_v56 = vmax.f32 %v1369_v47, 0.0  ;;  %v1371_v61 = vadd.f32 %v1370_v41, %v1328_v55  ;;  %v1512_v9 = vmul.f32 %v2229_v60, %v2229_v60 }
 0x171   :  { %v1372_v50 = vpop.f32.mrf.mxu0  ;;  %v1414_v6 = vadd.f32 %v1413_v48, %v277_v49 }
 0x172   :  { %v1373_v57 = vadd.f32 %v1372_v50, %v1330_v51  ;;  %v1415_v58 = vpop.f32.mrf.mxu1  ;;  %v1513_v2 = vmul.f32 %v2227_v56, %v2227_v56  ;;  %v2237_v10 = vmax.f32 %v1371_v61, 0.0 }
 0x173   :  { %v1416_v15 = vadd.f32 %v1415_v58, %v281_v53 }
 0x174   :  { %v2233_v3 = vmax.f32 %v1373_v57, 0.0  ;;  %v1520_v21 = vadd.f32 %v1513_v2, %v1512_v9  ;;  %v1516_v27 = vmul.f32 %v2237_v10, %v2237_v10 }
 0x176   :  { %v1517_v19 = vmul.f32 %v2233_v3, %v2233_v3 }
 0x178   :  { %v1525_v33 = vadd.f32 %v1517_v19, %v1516_v27 }
 0x1ab   :  { %v1452_v62 = vpop.f32.mrf.mxu0 }
 0x1ac   :  { %v1495_v63 = vpop.f32.mrf.mxu1  ;;  %v1453_v1 = vadd.f32 %v1452_v62, %v1410_v59 }
 0x1ad   :  { %v1454_v4 = vpop.f32.mrf.mxu0 }
 0x1ae   :  { %v1497_v5 = vpop.f32.mrf.mxu1  ;;  %v1496_v7 = vadd.f32 %v1495_v63, %v1453_v1  ;;  %v1455_v8 = vadd.f32 %v1454_v4, %v1412_v0 }
 0x1af   :  { %v1456_v11 = vpop.f32.mrf.mxu0 }
 0x1b0   :  { %v1499_v14 = vpop.f32.mrf.mxu1  ;;  %v1506_v16 = vmax.f32 %v1496_v7, 0.0  ;;  %v1498_v17 = vadd.f32 %v1497_v5, %v1455_v8  ;;  %v1457_v18 = vadd.f32 %v1456_v11, %v1414_v6 }
 0x1b1   :  { %v1458_v20 = vpop.f32.mrf.mxu0 }
 0x1b2   :  { %v1514_v23 = vmul.f32 %v1506_v16, %v1506_v16  ;;  %v1507_v24 = vmax.f32 %v1498_v17, 0.0  ;;  %v1500_v25 = vadd.f32 %v1499_v14, %v1457_v18  ;;  %v1459_v26 = vadd.f32 %v1458_v20, %v1416_v15  ;;  %v1501_v28 = vpop.f32.mrf.mxu1 }
 0x1b4   :  { %v1510_v29 = vmax.f32 %v1500_v25, 0.0  ;;  %v1502_v30 = vadd.f32 %v1501_v28, %v1459_v26  ;;  %v1515_v31 = vmul.f32 %v1507_v24, %v1507_v24  ;;  %v1521_v32 = vadd.f32 %v1520_v21, %v1514_v23 }
 0x1b6   :  { %v1518_v12 = vmul.f32 %v1510_v29, %v1510_v29  ;;  %v1511_v34 = vmax.f32 %v1502_v30, 0.0  ;;  %v1522_v35 = vadd.f32 %v1521_v32, %v1515_v31 }
 0x1b8   :  { %v1519_v36 = vmul.f32 %v1511_v34, %v1511_v34  ;;  %1523 = vadd.xlane.f32.xlu0 %v1522_v35  ;;  %v1526_v37 = vadd.f32 %v1525_v33, %v1518_v12 }
 0x1ba   :  { %v1527_v54 = vadd.f32 %v1526_v37, %v1519_v36 }
 0x1bc   :  { %1528 = vadd.xlane.f32.xlu0 %v1527_v54 }
 0x241   :  { %v1524_v13 = vpop.xlane.xlu0 %1523 }
 0x242   :  { %2074 = vrsqrt.f32 %v1524_v13  ;;  %vm1532_vm0 = vcmp.eq.f32.partialorder %v1524_v13, inf  ;;  %v1535_v40 = vand.u32 2147483648, %v1524_v13  ;;  %vm1534_vm1 = vcmp.eq.f32.partialorder %v1524_v13, 0.0 }
 0x245   :  { %v1529_v38 = vpop.xlane.xlu0 %1528 }
 0x246   :  { %2076 = vrsqrt.f32 %v1529_v38  ;;  %vm1539_vm2 = vcmp.eq.f32.partialorder %v1529_v38, inf  ;;  %v1542_v46 = vand.u32 2147483648, %v1529_v38  ;;  %vm1541_vm3 = vcmp.eq.f32.partialorder %v1529_v38, 0.0 }
 0x24f   :  { %v2075_v22 = vpop.eup %2074 }
 0x250   :  { %v1531_v39 = vmul.f32 %v2075_v22, %v1524_v13 }
 0x252   :  { %v1533_v41 = vsel %vm1532_vm0, %v1524_v13, %v1531_v39 }
 0x253   :  { %v2077_v42 = vpop.eup %2076  ;;  %v1536_v43 = vsel %vm1534_vm1, %v1535_v40, %v1533_v41 }
 0x254   :  { %v1544_v44 = vmax.f32 %v1536_v43, 1e-12  ;;  %v1538_v45 = vmul.f32 %v2077_v42, %v1529_v38 }
 0x256   :  { %v1546_v47 = vmul.f32 2.0, %v1544_v44  ;;  %v1540_v48 = vsel %vm1539_vm2, %v1529_v38, %v1538_v45 }
 0x257   :  { %v1543_v49 = vsel %vm1541_vm3, %v1542_v46, %v1540_v48 }
 0x258   :  { %2078 = vrsqrt.f32 %v1546_v47  ;;  %v1545_v50 = vmax.f32 %v1543_v49, 1e-12 }
 0x25a   :  { %v1547_v51 = vmul.f32 2.0, %v1545_v50 }
 0x25c   :  { %2080 = vrsqrt.f32 %v1547_v51 }
 0x265   :  { %v2079_v52 = vpop.eup %2078 }
 0x266   :  { %v1550_v53 = vmul.f32 %v2079_v52, %v2229_v60  ;;  %v1551_v55 = vmul.f32 %v2079_v52, %v2227_v56  ;;  %v1552_v57 = vmul.f32 %v2079_v52, %v1506_v16  ;;  %v1553_v58 = vmul.f32 %v2079_v52, %v1507_v24 }
 0x268   :  { %1558 = vst [vmem:[#allocation8] sm:$0xff] %v1550_v53  ;;  %1559 = vst [vmem:[#allocation8 + $0x8] sm:$0xff] %v1551_v55 }
 0x269   :  { %1560 = vst [vmem:[#allocation8 + $0x10] sm:$0xff] %v1552_v57  ;;  %1561 = vst [vmem:[#allocation8 + $0x18] sm:$0xff] %v1553_v58  ;;  %v2081_v59 = vpop.eup %2080 }
 0x26a   :  { %v1554_v61 = vmul.f32 %v2081_v59, %v2237_v10  ;;  %v1555_v62 = vmul.f32 %v2081_v59, %v2233_v3  ;;  %v1556_v63 = vmul.f32 %v2081_v59, %v1510_v29  ;;  %v1557_v0 = vmul.f32 %v2081_v59, %v1511_v34 }
 0x26c   :  { %1562 = vst [vmem:[#allocation8 + $0x20] sm:$0xff] %v1554_v61  ;;  %1563 = vst [vmem:[#allocation8 + $0x28] sm:$0xff] %v1555_v62 }
 0x26d   :  { %1564 = vst [vmem:[#allocation8 + $0x30] sm:$0xff] %v1556_v63  ;;  %1565 = vst [vmem:[#allocation8 + $0x38] sm:$0xff] %v1557_v0 }
 0x26e   :  { %1570 = vsyncadd [#allocation4], 512  ;;  %s2175_s0 = smov [#allocation8]  }
 0x26f   :  { %s1571_s2 = sshll.u32 %s2175_s0, 4  ;;  %s1572_s2 = int_to_ptr.vmem [resolvable:$true] %s1571_s2 }
 0x270   :  { %s2142_s4 = scalar_lea.vmem %s1572_s2, 512  ;;  %s2146_s5 = scalar_lea.vmem %s1572_s2, 1024 }
 0x271   :  { %p2143_p1 = scmp.ne.s32.totalorder %s1572_s2, %s2142_s4  ;;  %p2147_p2 = scmp.lt.s32.totalorder %s1572_s2, %s1572_s2 }
 0x272   :  { %p2148_p3 = scmp.lt.s32.totalorder %s2146_s5, %s2142_s4 }
 0x274   :  { %p2149_p4 = por %p2148_p3, %p2147_p2 }
 0x276   :  { %p2150_p5 = pnand %p2149_p4, %p2143_p1 }
 0x278   :  { %2153 = shalt.err (!%p2150_p5)
}
 0x279   :  { %s2176_s6 = smov 512   ;;  %s2177_s7 = smov 32  }
 0x27a   :  { %1577 = dma.vmem_to_hbm [thread:$0]  %s1572_s2, 512, %s2253_s3, [#allocation4], %s2176_s6, %s2176_s6, %s2177_s7  }
 0x27b   :  { %2166 = dma.done.wait [#allocation4], 1024  }
 0x27c   :  { %2167 = vsyncadd [#allocation4], 4294966272 }
 0x27d   :  { %1581 = vsyncpa [#allocation3], 1 }
 0x27e   :  { %1582 = vsyncpa [#allocation6], 1 }
 0x27f   :  { %1583 = vsyncpa [#allocation4], 1 }

</bundles_post_ra>
